<compile_context>
chip_gen: v7x
topology: tpu7x:2x2x1
jax: 0.10.0
libtpu: 0.0.40
codegen_flags: <defaults>
</compile_context>

<pallas_src>
import numpy as np

import jax
import jax.numpy as jnp
from jax.experimental import pallas as pl
from jax.experimental.pallas import tpu as pltpu


# ---------------------------------------------------------------------------
# Kernel
# ---------------------------------------------------------------------------
# Packed-weight layout (34 f32 values in SMEM):
#   [0:4)    layer1 (conv1, 1->2):        w00, b0, w10, b1
#   [4:10)   layer2 (conv2, 2->2):        w00, w01, b0, w10, w11, b1
#   [10:16)  layer3 (conv4 ∘ conv6):      same 6-value layout
#   [16:22)  layer4 (conv7 ∘ conv3):      same
#   [22:28)  layer5 (conv5 ∘ conv5):      same
#   [28:34)  layer6 (conv3):              same
def _fused_conv_chain_kernel(w_ref, x_ref, o_ref):
    x = x_ref[...]  # (1, N_PAD) f32, single vreg-row

    # Layer 1: conv1 (1 -> 2 channels) + ReLU, scalar-broadcast VPU math.
    h0 = jnp.maximum(w_ref[0] * x + w_ref[1], 0.0)
    h1 = jnp.maximum(w_ref[2] * x + w_ref[3], 0.0)

    def affine2(a0, a1, off, relu):
        o0 = w_ref[off + 0] * a0 + w_ref[off + 1] * a1 + w_ref[off + 2]
        o1 = w_ref[off + 3] * a0 + w_ref[off + 4] * a1 + w_ref[off + 5]
        if relu:
            o0 = jnp.maximum(o0, 0.0)
            o1 = jnp.maximum(o1, 0.0)
        return o0, o1

    h0, h1 = affine2(h0, h1, 4, True)    # conv2 + ReLU
    h0, h1 = affine2(h0, h1, 10, True)   # (conv4 ∘ conv6) + ReLU
    h0, h1 = affine2(h0, h1, 16, True)   # (conv7 ∘ conv3) + ReLU
    h0, h1 = affine2(h0, h1, 22, True)   # (conv5 ∘ conv5) + ReLU
    h0, h1 = affine2(h0, h1, 28, False)  # conv3 (no ReLU)

    # Single store of the full (2, N_PAD) output tile.
    o_ref[...] = jnp.concatenate([h0, h1], axis=0)


# ---------------------------------------------------------------------------
# One-time (init) weight folding & packing — pure numpy, zero XLA dispatches.
# ---------------------------------------------------------------------------
def pack_params(params):
    """Fold ReLU-free conv pairs and pack all weights into one (34,) f32 vec."""
    p = {k: np.asarray(jax.device_get(v), dtype=np.float32)
         for k, v in params.items()}

    def fold(w_out, b_out, w_in, b_in):
        # y = W_out (W_in x + b_in) + b_out
        return w_out @ w_in, w_out @ b_in + b_out

    def pack22(w, b):
        # (2,2) W and (2,) b -> flat [w00, w01, b0, w10, w11, b1]
        return np.concatenate([w, b.reshape(2, 1)], axis=1).reshape(-1)

    wA, bA = fold(p["w4"], p["b4"], p["w6"], p["b6"])  # conv4 ∘ conv6
    wB, bB = fold(p["w7"], p["b7"], p["w3"], p["b3"])  # conv7 ∘ conv3
    wC, bC = fold(p["w5"], p["b5"], p["w5"], p["b5"])  # conv5 ∘ conv5

    w1, b1 = p["w1"], p["b1"]
    flat = np.concatenate([
        np.array([w1[0, 0], b1[0], w1[1, 0], b1[1]], dtype=np.float32),
        pack22(p["w2"], p["b2"]),
        pack22(wA, bA),
        pack22(wB, bB),
        pack22(wC, bC),
        pack22(p["w3"], p["b3"]),
    ]).astype(np.float32)
    assert flat.shape == (34,)
    return jnp.asarray(flat)  # cached device array, reused every call


# ---------------------------------------------------------------------------
# Jitted wrapper: all layout plumbing fuses around the single pallas_call.
# ---------------------------------------------------------------------------
@jax.jit
def model_forward(x_ncl, flat_w):
    """x_ncl: (N, 1, L) float32, flat_w: (34,) f32 packed weights -> (N, 2, L)."""
    N, C, L = x_ncl.shape
    assert C == 1
    nl = N * L
    n_pad = max(128, pl.cdiv(nl, 128) * 128)  # lane-dense slab width

    # C == 1: no transpose needed, plain reshape.  Pad fuses under jit.
    x2d = x_ncl.reshape(C, nl).astype(jnp.float32)
    x_pad = jnp.pad(x2d, ((0, 0), (0, n_pad - nl)))

    out_pad = pl.pallas_call(
        _fused_conv_chain_kernel,
        out_shape=jax.ShapeDtypeStruct((2, n_pad), jnp.float32),
        in_specs=[
            pl.BlockSpec(memory_space=pltpu.MemorySpace.SMEM),   # packed weights
            pl.BlockSpec(memory_space=pltpu.MemorySpace.VMEM),   # padded input
        ],
        out_specs=pl.BlockSpec(memory_space=pltpu.MemorySpace.VMEM),
    )(flat_w, x_pad)

    # Padded lanes hold bias garbage — slice them off before any reshaping.
    out2d = out_pad[:, :nl]
    # Back to PyTorch NCL layout (fuses into the consumer fusion under jit).
    return out2d.reshape(2, N, L).transpose(1, 0, 2)


# ---------------------------------------------------------------------------
# Reference (pure JAX, unfolded) + init
# ---------------------------------------------------------------------------
def reference_forward(x_ncl, params):
    def conv(i, h):
        return params[f"w{i}"] @ h + params[f"b{i}"][:, None]

    N, _, L = x_ncl.shape
    x2d = jnp.transpose(x_ncl, (1, 0, 2)).reshape(1, N * L)
    h = jax.nn.relu(conv(1, x2d))
    out = conv(6, jax.nn.relu(conv(2, h)))
    out = conv(3, jax.nn.relu(conv(4, out)))
    out = conv(5, jax.nn.relu(conv(7, out)))
    out = conv(3, jax.nn.relu(conv(5, out)))
    return out.reshape(2, N, L).transpose(1, 0, 2)


def init_params(key):
    """Deterministic init matching the Conv1d shapes of the module.

    conv1: Conv1d(1, 2, 1) -> W (2, 1), b (2,)
    conv2..conv7: Conv1d(2, 2, 1) -> W (2, 2), b (2,)
    """
    params = {}
    in_channels = {1: 1, 2: 2, 3: 2, 4: 2, 5: 2, 6: 2, 7: 2}
    for i in range(1, 8):
        key, kw, kb = jax.random.split(key, 3)
        cin = in_channels[i]
        bound = 1.0 / (cin ** 0.5)  # PyTorch default Conv1d init range
        params[f"w{i}"] = jax.random.uniform(
            kw, (2, cin), jnp.float32, minval=-bound, maxval=bound
        )
        params[f"b{i}"] = jax.random.uniform(
            kb, (2,), jnp.float32, minval=-bound, maxval=bound
        )
    return params


if __name__ == "__main__":
    key = jax.random.PRNGKey(0)
    k_in, k_p = jax.random.split(key)

    # Same shape as the PyTorch script: torch.randn(3, 1, 20)
    x = jax.random.normal(k_in, (3, 1, 20), dtype=jnp.float32)
    params = init_params(k_p)

    # One-time fold/pack at init; reused across every forward call.
    flat_w = pack_params(params)

    out = model_forward(x, flat_w)
    out = jax.block_until_ready(out)
    assert out.shape == (3, 2, 20), out.shape
    assert out.dtype == jnp.float32

    ref = reference_forward(x, params)
    assert jnp.allclose(out, ref, rtol=1e-4, atol=1e-4), float(
        jnp.max(jnp.abs(out - ref))
    )

    print("KERNEL_OK")
</pallas_src>

<mosaic_0001>
module attributes {stable_mosaic.version = 11 : i64} {
  func.func @_fused_conv_chain_kernel(%arg0: memref<34xf32, #tpu.memory_space<smem>>, %arg1: memref<1x128xf32, #tpu.memory_space<vmem>>, %arg2: memref<2x128xf32, #tpu.memory_space<vmem>>) attributes {dimension_semantics = [], scalar_prefetch = 0 : i64, scratch_operands = 0 : i64, tpu.core_type = #tpu.core_type<tc>} {
    %c0 = arith.constant 0 : index
    %c0_0 = arith.constant 0 : index
    %0 = vector.load %arg1[%c0, %c0_0] : memref<1x128xf32, #tpu.memory_space<vmem>>, vector<1x128xf32>
    %c0_1 = arith.constant 0 : index
    %1 = memref.load %arg0[%c0_1] : memref<34xf32, #tpu.memory_space<smem>>
    %2 = vector.broadcast %1 : f32 to vector<1x128xf32>
    %3 = arith.mulf %2, %0 : vector<1x128xf32>
    %c1 = arith.constant 1 : index
    %4 = memref.load %arg0[%c1] : memref<34xf32, #tpu.memory_space<smem>>
    %5 = vector.broadcast %4 : f32 to vector<1x128xf32>
    %6 = arith.addf %3, %5 : vector<1x128xf32>
    %cst = arith.constant 0.000000e+00 : f32
    %7 = vector.broadcast %cst : f32 to vector<1x128xf32>
    %8 = arith.maximumf %6, %7 : vector<1x128xf32>
    %c2 = arith.constant 2 : index
    %9 = memref.load %arg0[%c2] : memref<34xf32, #tpu.memory_space<smem>>
    %10 = vector.broadcast %9 : f32 to vector<1x128xf32>
    %11 = arith.mulf %10, %0 : vector<1x128xf32>
    %c3 = arith.constant 3 : index
    %12 = memref.load %arg0[%c3] : memref<34xf32, #tpu.memory_space<smem>>
    %13 = vector.broadcast %12 : f32 to vector<1x128xf32>
    %14 = arith.addf %11, %13 : vector<1x128xf32>
    %cst_2 = arith.constant 0.000000e+00 : f32
    %15 = vector.broadcast %cst_2 : f32 to vector<1x128xf32>
    %16 = arith.maximumf %14, %15 : vector<1x128xf32>
    %c4 = arith.constant 4 : index
    %17 = memref.load %arg0[%c4] : memref<34xf32, #tpu.memory_space<smem>>
    %18 = vector.broadcast %17 : f32 to vector<1x128xf32>
    %19 = arith.mulf %18, %8 : vector<1x128xf32>
    %c5 = arith.constant 5 : index
    %20 = memref.load %arg0[%c5] : memref<34xf32, #tpu.memory_space<smem>>
    %21 = vector.broadcast %20 : f32 to vector<1x128xf32>
    %22 = arith.mulf %21, %16 : vector<1x128xf32>
    %23 = arith.addf %19, %22 : vector<1x128xf32>
    %c6 = arith.constant 6 : index
    %24 = memref.load %arg0[%c6] : memref<34xf32, #tpu.memory_space<smem>>
    %25 = vector.broadcast %24 : f32 to vector<1x128xf32>
    %26 = arith.addf %23, %25 : vector<1x128xf32>
    %c7 = arith.constant 7 : index
    %27 = memref.load %arg0[%c7] : memref<34xf32, #tpu.memory_space<smem>>
    %28 = vector.broadcast %27 : f32 to vector<1x128xf32>
    %29 = arith.mulf %28, %8 : vector<1x128xf32>
    %c8 = arith.constant 8 : index
    %30 = memref.load %arg0[%c8] : memref<34xf32, #tpu.memory_space<smem>>
    %31 = vector.broadcast %30 : f32 to vector<1x128xf32>
    %32 = arith.mulf %31, %16 : vector<1x128xf32>
    %33 = arith.addf %29, %32 : vector<1x128xf32>
    %c9 = arith.constant 9 : index
    %34 = memref.load %arg0[%c9] : memref<34xf32, #tpu.memory_space<smem>>
    %35 = vector.broadcast %34 : f32 to vector<1x128xf32>
    %36 = arith.addf %33, %35 : vector<1x128xf32>
    %cst_3 = arith.constant 0.000000e+00 : f32
    %37 = vector.broadcast %cst_3 : f32 to vector<1x128xf32>
    %38 = arith.maximumf %26, %37 : vector<1x128xf32>
    %cst_4 = arith.constant 0.000000e+00 : f32
    %39 = vector.broadcast %cst_4 : f32 to vector<1x128xf32>
    %40 = arith.maximumf %36, %39 : vector<1x128xf32>
    %c10 = arith.constant 10 : index
    %41 = memref.load %arg0[%c10] : memref<34xf32, #tpu.memory_space<smem>>
    %42 = vector.broadcast %41 : f32 to vector<1x128xf32>
    %43 = arith.mulf %42, %38 : vector<1x128xf32>
    %c11 = arith.constant 11 : index
    %44 = memref.load %arg0[%c11] : memref<34xf32, #tpu.memory_space<smem>>
    %45 = vector.broadcast %44 : f32 to vector<1x128xf32>
    %46 = arith.mulf %45, %40 : vector<1x128xf32>
    %47 = arith.addf %43, %46 : vector<1x128xf32>
    %c12 = arith.constant 12 : index
    %48 = memref.load %arg0[%c12] : memref<34xf32, #tpu.memory_space<smem>>
    %49 = vector.broadcast %48 : f32 to vector<1x128xf32>
    %50 = arith.addf %47, %49 : vector<1x128xf32>
    %c13 = arith.constant 13 : index
    %51 = memref.load %arg0[%c13] : memref<34xf32, #tpu.memory_space<smem>>
    %52 = vector.broadcast %51 : f32 to vector<1x128xf32>
    %53 = arith.mulf %52, %38 : vector<1x128xf32>
    %c14 = arith.constant 14 : index
    %54 = memref.load %arg0[%c14] : memref<34xf32, #tpu.memory_space<smem>>
    %55 = vector.broadcast %54 : f32 to vector<1x128xf32>
    %56 = arith.mulf %55, %40 : vector<1x128xf32>
    %57 = arith.addf %53, %56 : vector<1x128xf32>
    %c15 = arith.constant 15 : index
    %58 = memref.load %arg0[%c15] : memref<34xf32, #tpu.memory_space<smem>>
    %59 = vector.broadcast %58 : f32 to vector<1x128xf32>
    %60 = arith.addf %57, %59 : vector<1x128xf32>
    %cst_5 = arith.constant 0.000000e+00 : f32
    %61 = vector.broadcast %cst_5 : f32 to vector<1x128xf32>
    %62 = arith.maximumf %50, %61 : vector<1x128xf32>
    %cst_6 = arith.constant 0.000000e+00 : f32
    %63 = vector.broadcast %cst_6 : f32 to vector<1x128xf32>
    %64 = arith.maximumf %60, %63 : vector<1x128xf32>
    %c16 = arith.constant 16 : index
    %65 = memref.load %arg0[%c16] : memref<34xf32, #tpu.memory_space<smem>>
    %66 = vector.broadcast %65 : f32 to vector<1x128xf32>
    %67 = arith.mulf %66, %62 : vector<1x128xf32>
    %c17 = arith.constant 17 : index
    %68 = memref.load %arg0[%c17] : memref<34xf32, #tpu.memory_space<smem>>
    %69 = vector.broadcast %68 : f32 to vector<1x128xf32>
    %70 = arith.mulf %69, %64 : vector<1x128xf32>
    %71 = arith.addf %67, %70 : vector<1x128xf32>
    %c18 = arith.constant 18 : index
    %72 = memref.load %arg0[%c18] : memref<34xf32, #tpu.memory_space<smem>>
    %73 = vector.broadcast %72 : f32 to vector<1x128xf32>
    %74 = arith.addf %71, %73 : vector<1x128xf32>
    %c19 = arith.constant 19 : index
    %75 = memref.load %arg0[%c19] : memref<34xf32, #tpu.memory_space<smem>>
    %76 = vector.broadcast %75 : f32 to vector<1x128xf32>
    %77 = arith.mulf %76, %62 : vector<1x128xf32>
    %c20 = arith.constant 20 : index
    %78 = memref.load %arg0[%c20] : memref<34xf32, #tpu.memory_space<smem>>
    %79 = vector.broadcast %78 : f32 to vector<1x128xf32>
    %80 = arith.mulf %79, %64 : vector<1x128xf32>
    %81 = arith.addf %77, %80 : vector<1x128xf32>
    %c21 = arith.constant 21 : index
    %82 = memref.load %arg0[%c21] : memref<34xf32, #tpu.memory_space<smem>>
    %83 = vector.broadcast %82 : f32 to vector<1x128xf32>
    %84 = arith.addf %81, %83 : vector<1x128xf32>
    %cst_7 = arith.constant 0.000000e+00 : f32
    %85 = vector.broadcast %cst_7 : f32 to vector<1x128xf32>
    %86 = arith.maximumf %74, %85 : vector<1x128xf32>
    %cst_8 = arith.constant 0.000000e+00 : f32
    %87 = vector.broadcast %cst_8 : f32 to vector<1x128xf32>
    %88 = arith.maximumf %84, %87 : vector<1x128xf32>
    %c22 = arith.constant 22 : index
    %89 = memref.load %arg0[%c22] : memref<34xf32, #tpu.memory_space<smem>>
    %90 = vector.broadcast %89 : f32 to vector<1x128xf32>
    %91 = arith.mulf %90, %86 : vector<1x128xf32>
    %c23 = arith.constant 23 : index
    %92 = memref.load %arg0[%c23] : memref<34xf32, #tpu.memory_space<smem>>
    %93 = vector.broadcast %92 : f32 to vector<1x128xf32>
    %94 = arith.mulf %93, %88 : vector<1x128xf32>
    %95 = arith.addf %91, %94 : vector<1x128xf32>
    %c24 = arith.constant 24 : index
    %96 = memref.load %arg0[%c24] : memref<34xf32, #tpu.memory_space<smem>>
    %97 = vector.broadcast %96 : f32 to vector<1x128xf32>
    %98 = arith.addf %95, %97 : vector<1x128xf32>
    %c25 = arith.constant 25 : index
    %99 = memref.load %arg0[%c25] : memref<34xf32, #tpu.memory_space<smem>>
    %100 = vector.broadcast %99 : f32 to vector<1x128xf32>
    %101 = arith.mulf %100, %86 : vector<1x128xf32>
    %c26 = arith.constant 26 : index
    %102 = memref.load %arg0[%c26] : memref<34xf32, #tpu.memory_space<smem>>
    %103 = vector.broadcast %102 : f32 to vector<1x128xf32>
    %104 = arith.mulf %103, %88 : vector<1x128xf32>
    %105 = arith.addf %101, %104 : vector<1x128xf32>
    %c27 = arith.constant 27 : index
    %106 = memref.load %arg0[%c27] : memref<34xf32, #tpu.memory_space<smem>>
    %107 = vector.broadcast %106 : f32 to vector<1x128xf32>
    %108 = arith.addf %105, %107 : vector<1x128xf32>
    %cst_9 = arith.constant 0.000000e+00 : f32
    %109 = vector.broadcast %cst_9 : f32 to vector<1x128xf32>
    %110 = arith.maximumf %98, %109 : vector<1x128xf32>
    %cst_10 = arith.constant 0.000000e+00 : f32
    %111 = vector.broadcast %cst_10 : f32 to vector<1x128xf32>
    %112 = arith.maximumf %108, %111 : vector<1x128xf32>
    %c28 = arith.constant 28 : index
    %113 = memref.load %arg0[%c28] : memref<34xf32, #tpu.memory_space<smem>>
    %114 = vector.broadcast %113 : f32 to vector<1x128xf32>
    %115 = arith.mulf %114, %110 : vector<1x128xf32>
    %c29 = arith.constant 29 : index
    %116 = memref.load %arg0[%c29] : memref<34xf32, #tpu.memory_space<smem>>
    %117 = vector.broadcast %116 : f32 to vector<1x128xf32>
    %118 = arith.mulf %117, %112 : vector<1x128xf32>
    %119 = arith.addf %115, %118 : vector<1x128xf32>
    %c30 = arith.constant 30 : index
    %120 = memref.load %arg0[%c30] : memref<34xf32, #tpu.memory_space<smem>>
    %121 = vector.broadcast %120 : f32 to vector<1x128xf32>
    %122 = arith.addf %119, %121 : vector<1x128xf32>
    %c31 = arith.constant 31 : index
    %123 = memref.load %arg0[%c31] : memref<34xf32, #tpu.memory_space<smem>>
    %124 = vector.broadcast %123 : f32 to vector<1x128xf32>
    %125 = arith.mulf %124, %110 : vector<1x128xf32>
    %c32 = arith.constant 32 : index
    %126 = memref.load %arg0[%c32] : memref<34xf32, #tpu.memory_space<smem>>
    %127 = vector.broadcast %126 : f32 to vector<1x128xf32>
    %128 = arith.mulf %127, %112 : vector<1x128xf32>
    %129 = arith.addf %125, %128 : vector<1x128xf32>
    %c33 = arith.constant 33 : index
    %130 = memref.load %arg0[%c33] : memref<34xf32, #tpu.memory_space<smem>>
    %131 = vector.broadcast %130 : f32 to vector<1x128xf32>
    %132 = arith.addf %129, %131 : vector<1x128xf32>
    %133 = tpu.concatenate %122, %132 in 0 : vector<1x128xf32>, vector<1x128xf32> -> vector<2x128xf32>
    %c0_11 = arith.constant 0 : index
    %c0_12 = arith.constant 0 : index
    %134 = vector.load %arg2[%c0_11, %c0_12] : memref<2x128xf32, #tpu.memory_space<vmem>>, vector<2x128xf32>
    tpu.vector_store %arg2[%c0_11, %c0_12], %133 {strides = array<i32>} : memref<2x128xf32, #tpu.memory_space<vmem>>, vector<2x128xf32>,
    return
  }
}

</mosaic_0001>

<bundles_post_ra>
// kernel: model_forward.1
= control target key start
LH: loop header
LB: loop body
LE: loop exit
PB: predicated region body
PF: predicated region fallthrough
CT: control target
= control target key end

     0   :  { %7 = vsyncpa [#allocation3], 0  ;;  %s246_s0 = inlined_call_operand.vmem [shape: f32[34], index: 0, kind: input, shape index: {}]   ;;  %s247_s1 = inlined_call_operand.vmem [shape: f32[1,128], index: 1, kind: input, shape index: {}]   ;;  %s248_s2 = inlined_call_operand.vmem [shape: f32[2,128], index: 2, kind: output, shape index: {}]  }
   0x1   :  { %s14_s11 = sshll.u32 %s246_s0, 4  ;;  %s15_s11 = int_to_ptr.vmem [resolvable:$true] %s14_s11 }
   0x2   :  { %s195_s12 = scalar_lea.vmem %s15_s11, 16  ;;  %p200_p1 = scmp.lt.s32.totalorder %s15_s11, %s15_s11 }
   0x3   :  { %p196_p0 = scmp.ne.s32.totalorder %s15_s11, %s195_s12  ;;  %p201_p2 = scmp.lt.s32.totalorder %s195_s12, %s195_s12 }
   0x5   :  { %p202_p3 = por %p201_p2, %p200_p1 }
   0x7   :  { %p203_p4 = pnand %p202_p3, %p196_p0 }
   0x9   :  { %206 = shalt.err (!%p203_p4)
}
   0xa   :  { %s209_s13 = smov [#allocation2]  }
   0xb   :  { %17 = dma.vmem_to_smem %s15_s11, 16, %s209_s13, [#allocation3]  }
   0xc   :  { %207 = dma.done.wait [#allocation3], 16  }
   0xd   :  { %208 = vsyncadd [#allocation3], 4294967280 }
   0xe   :  { %23 = sfence }
   0xf   :  { %s25_s14 = sld [smem:[#allocation2]]  ;;  %s161_s15 = sld [smem:[#allocation2 + $0x1]]  ;;  %v24_v0 = vld [vmem:[%s247_s1] sm:$0x1]  ;;  %vm153_vm0 = vcmask 1040384  }
  0x10   :  { %s162_s16 = sld [smem:[#allocation2 + $0x2]]  ;;  %s163_s17 = sld [smem:[#allocation2 + $0x3]] }
  0x11   :  { %s164_s18 = sld [smem:[#allocation2 + $0x4]]  ;;  %s165_s19 = sld [smem:[#allocation2 + $0x5]] }
  0x12   :  { %s167_s0 = sld [smem:[#allocation2 + $0x7]]  ;;  %s168_s22 = sld [smem:[#allocation2 + $0x8]] }
  0x13   :  { %s166_s23 = sld [smem:[#allocation2 + $0x6]]  ;;  %s169_s24 = sld [smem:[#allocation2 + $0x9]] }
  0x14   :  { %s170_s25 = sld [smem:[#allocation2 + $0xa]]  ;;  %s171_s26 = sld [smem:[#allocation2 + $0xb]] }
  0x15   :  { %v26_v1 = vstv %s25_s14  ;;  %v29_v2 = vstv %s161_s15  ;;  %s173_s27 = sld [smem:[#allocation2 + $0xd]]  ;;  %s174_s1 = sld [smem:[#allocation2 + $0xe]] }
  0x16   :  { %v27_v3 = vmul.f32 %v26_v1, %v24_v0  ;;  %v33_v4 = vstv %s162_s16  ;;  %v36_v5 = vstv %s163_s17  ;;  %s172_s28 = sld [smem:[#allocation2 + $0xc]]  ;;  %s175_s29 = sld [smem:[#allocation2 + $0xf]] }
  0x17   :  { %v34_v6 = vmul.f32 %v33_v4, %v24_v0  ;;  %v40_v9 = vstv %s164_s18  ;;  %v43_v12 = vstv %s165_s19  ;;  %s231_s30 = sld [smem:[#allocation2 + $0x10]]  ;;  %s233_s3 = sld [smem:[#allocation2 + $0x11]] }
  0x18   :  { %v30_v7 = vadd.f32 %v29_v2, %v27_v3  ;;  %v50_v10 = vstv %s167_s0  ;;  %v53_v13 = vstv %s168_s22  ;;  %s179_s4 = sld [smem:[#allocation2 + $0x13]]  ;;  %s180_s5 = sld [smem:[#allocation2 + $0x14]] }
  0x19   :  { %v37_v8 = vadd.f32 %v36_v5, %v34_v6  ;;  %v47_v19 = vstv %s166_s23  ;;  %v57_v20 = vstv %s169_s24  ;;  %s178_s6 = sld [smem:[#allocation2 + $0x12]]  ;;  %s181_s7 = sld [smem:[#allocation2 + $0x15]] }
  0x1a   :  { %v31_v11 = vmax.f32 %v30_v7, 0.0  ;;  %v62_v25 = vstv %s170_s25  ;;  %v65_v26 = vstv %s171_s26  ;;  %s235_s8 = sld [smem:[#allocation2 + $0x16]]  ;;  %s237_s9 = sld [smem:[#allocation2 + $0x17]]  ;;  %v148_v7 = vlaneseq }
  0x1b   :  { %v38_v14 = vmax.f32 %v37_v8, 0.0  ;;  %v72_v27 = vstv %s173_s27  ;;  %v75_v28 = vstv %s174_s1  ;;  %s185_s10 = sld [smem:[#allocation2 + $0x19]]  ;;  %s186_s11 = sld [smem:[#allocation2 + $0x1a]] }
  0x1c   :  { %v41_v15 = vmul.f32 %v40_v9, %v31_v11  ;;  %v51_v16 = vmul.f32 %v50_v10, %v31_v11  ;;  %v69_v35 = vstv %s172_s28  ;;  %v79_v36 = vstv %s175_s29  ;;  %s184_s12 = sld [smem:[#allocation2 + $0x18]]  ;;  %s187_s13 = sld [smem:[#allocation2 + $0x1b]] }
  0x1d   :  { %v44_v17 = vmul.f32 %v43_v12, %v38_v14  ;;  %v54_v18 = vmul.f32 %v53_v13, %v38_v14  ;;  %v84_v41 = vstv %s231_s30  ;;  %v87_v42 = vstv %s233_s3  ;;  %s188_s14 = sld [smem:[#allocation2 + $0x1c]]  ;;  %s189_s15 = sld [smem:[#allocation2 + $0x1d]] }
  0x1e   :  { %v94_v43 = vstv %s179_s4  ;;  %v97_v44 = vstv %s180_s5  ;;  %s191_s16 = sld [smem:[#allocation2 + $0x1f]]  ;;  %s192_s17 = sld [smem:[#allocation2 + $0x20]] }
  0x1f   :  { %v45_v21 = vadd.f32 %v44_v17, %v41_v15  ;;  %v55_v22 = vadd.f32 %v54_v18, %v51_v16  ;;  %v91_v51 = vstv %s178_s6  ;;  %v101_v52 = vstv %s181_s7  ;;  %s190_s18 = sld [smem:[#allocation2 + $0x1e]]  ;;  %s193_s19 = sld [smem:[#allocation2 + $0x21]] }
  0x20   :  { %v106_v57 = vstv %s235_s8  ;;  %v109_v58 = vstv %s237_s9  ;;  %v149_v16 = vshrl.u32 %v148_v7, 7 }
  0x21   :  { %v48_v23 = vadd.f32 %v47_v19, %v45_v21  ;;  %v58_v24 = vadd.f32 %v57_v20, %v55_v22  ;;  %v116_v59 = vstv %s185_s10  ;;  %v119_v60 = vstv %s186_s11 }
  0x22   :  { %v113_v3 = vstv %s184_s12  ;;  %v123_v4 = vstv %s187_s13 }
  0x23   :  { %v59_v29 = vmax.f32 %v48_v23, 0.0  ;;  %v60_v30 = vmax.f32 %v58_v24, 0.0  ;;  %v128_v10 = vstv %s188_s14  ;;  %v131_v11 = vstv %s189_s15 }
  0x24   :  { %v138_v12 = vstv %s191_s16  ;;  %v141_v13 = vstv %s192_s17 }
  0x25   :  { %v63_v31 = vmul.f32 %v62_v25, %v59_v29  ;;  %v66_v32 = vmul.f32 %v65_v26, %v60_v30  ;;  %v73_v33 = vmul.f32 %v72_v27, %v59_v29  ;;  %v76_v34 = vmul.f32 %v75_v28, %v60_v30 }
  0x26   :  { %v135_v21 = vstv %s190_s18  ;;  %v145_v22 = vstv %s193_s19  ;;  %v150_v25 = vsub.s32 0, %v149_v16 }
  0x27   :  { %v67_v37 = vadd.f32 %v66_v32, %v63_v31  ;;  %v77_v38 = vadd.f32 %v76_v34, %v73_v33 }
  0x29   :  { %v70_v39 = vadd.f32 %v69_v35, %v67_v37  ;;  %v80_v40 = vadd.f32 %v79_v36, %v77_v38 }
  0x2b   :  { %v81_v45 = vmax.f32 %v70_v39, 0.0  ;;  %v82_v46 = vmax.f32 %v80_v40, 0.0 }
  0x2d   :  { %v85_v47 = vmul.f32 %v84_v41, %v81_v45  ;;  %v88_v48 = vmul.f32 %v87_v42, %v82_v46  ;;  %v95_v49 = vmul.f32 %v94_v43, %v81_v45  ;;  %v98_v50 = vmul.f32 %v97_v44, %v82_v46 }
  0x2f   :  { %v89_v53 = vadd.f32 %v88_v48, %v85_v47  ;;  %v99_v54 = vadd.f32 %v98_v50, %v95_v49 }
  0x31   :  { %v92_v55 = vadd.f32 %v91_v51, %v89_v53  ;;  %v102_v56 = vadd.f32 %v101_v52, %v99_v54 }
  0x33   :  { %v103_v61 = vmax.f32 %v92_v55, 0.0  ;;  %v104_v62 = vmax.f32 %v102_v56, 0.0 }
  0x35   :  { %v107_v63 = vmul.f32 %v106_v57, %v103_v61  ;;  %v110_v0 = vmul.f32 %v109_v58, %v104_v62  ;;  %v117_v1 = vmul.f32 %v116_v59, %v103_v61  ;;  %v120_v2 = vmul.f32 %v119_v60, %v104_v62 }
  0x37   :  { %v111_v5 = vadd.f32 %v110_v0, %v107_v63  ;;  %v121_v6 = vadd.f32 %v120_v2, %v117_v1 }
  0x39   :  { %v114_v8 = vadd.f32 %v113_v3, %v111_v5  ;;  %v124_v9 = vadd.f32 %v123_v4, %v121_v6 }
  0x3b   :  { %v125_v14 = vmax.f32 %v114_v8, 0.0  ;;  %v126_v15 = vmax.f32 %v124_v9, 0.0 }
  0x3d   :  { %v129_v17 = vmul.f32 %v128_v10, %v125_v14  ;;  %v132_v18 = vmul.f32 %v131_v11, %v126_v15  ;;  %v139_v19 = vmul.f32 %v138_v12, %v125_v14  ;;  %v142_v20 = vmul.f32 %v141_v13, %v126_v15 }
  0x3f   :  { %v133_v23 = vadd.f32 %v132_v18, %v129_v17  ;;  %v143_v24 = vadd.f32 %v142_v20, %v139_v19 }
  0x41   :  { %v136_v26 = vadd.f32 %v135_v21, %v133_v23  ;;  %v146_v27 = vadd.f32 %v145_v22, %v143_v24 }
  0x43   :  { %v151_v28 = vrot.slane %v146_v27, %v150_v25 }
  0x45   :  { %v154_v29 = vsel %vm153_vm0, %v136_v26, %v151_v28 }
  0x46   :  { %155 = vst [vmem:[%s248_s2] sm:$0x3] %v154_v29 }
  0x47   :  { %160 = vsyncpa [#allocation3], 1 }

</bundles_post_ra>
